<compile_context>
chip_gen: v6e
topology: v6e:2x2x1
jax: 0.10.0
libtpu: 0.0.40
codegen_flags: <defaults>
</compile_context>

<pallas_src>
import jax
import jax.numpy as jnp
import numpy as np
from jax import lax
from jax.experimental import pallas as pl
from jax.experimental.pallas import tpu as pltpu

LANE = 128


def _round_up(x, m):
    return (x + m - 1) // m * m


# ----------------------------- Pallas kernel --------------------------------

def _matmul_bias_relu_kernel(x_ref, w_ref, b_ref, o_ref):
    # MXU GEMM in bf16 with f32 accumulation, f32 bias + ReLU epilogue,
    # single cast at the store.
    acc = jnp.dot(x_ref[...], w_ref[...], preferred_element_type=jnp.float32)
    acc = acc + b_ref[...]                      # (1, N) broadcast over rows
    o_ref[...] = jnp.maximum(acc, 0.0).astype(o_ref.dtype)


def fused_matmul_bias_relu(x2d, w, b, *, out_dtype, tm=512):
    """relu(x2d @ w + b), row-tiled Pallas GEMM.

    x2d : (M, K)  bf16  im2col patches (rows = output pixels)
    w   : (K, N)  bf16  lane-padded GEMM weights
    b   : (N,)    f32   lane-padded bias
    """
    M, K = x2d.shape
    K2, N = w.shape
    assert K == K2 and b.shape == (N,)

    # Row tile: big blocks amortize the ~0.35 us per-grid-step overhead while
    # staying well under scoped VMEM on every generation (v7x has only 64 MiB
    # physical).  Small problems use a single full-extent block.
    tm_eff = M if M <= tm else tm
    grid_m = pl.cdiv(M, tm_eff)

    return pl.pallas_call(
        _matmul_bias_relu_kernel,
        out_shape=jax.ShapeDtypeStruct((M, N), out_dtype),
        grid=(grid_m,),
        in_specs=[
            pl.BlockSpec((tm_eff, K), lambda i: (i, 0)),   # row tile of patches
            pl.BlockSpec((K, N), lambda i: (0, 0)),        # weights: VMEM-resident
            pl.BlockSpec((1, N), lambda i: (0, 0)),        # bias:    VMEM-resident
        ],
        out_specs=pl.BlockSpec((tm_eff, N), lambda i: (i, 0)),
        compiler_params=pltpu.CompilerParams(
            # Independent row tiles -> megacore can split the grid (2 TCs on v7x).
            dimension_semantics=("parallel",)),
    )(x2d, w, b.reshape(1, N))


# ------------------------------ JAX glue -------------------------------------

def _im2col(x_nhwc, kh=3, kw=3, stride=2):
    """(B, H, W, Cin) -> patches (B, Ho, Wo, kh*kw*Cin); flat order (kh, kw, cin)."""
    B, H, W, Cin = x_nhwc.shape
    Ho = (H - kh) // stride + 1
    Wo = (W - kw) // stride + 1
    cols = []
    for i in range(kh):
        for j in range(kw):
            cols.append(x_nhwc[:, i:i + stride * (Ho - 1) + 1:stride,
                                  j:j + stride * (Wo - 1) + 1:stride, :])
    patches = jnp.stack(cols, axis=3)                 # (B, Ho, Wo, kh*kw, Cin)
    return patches.reshape(B, Ho, Wo, kh * kw * Cin), Ho, Wo


def _conv1_gemm_weights(w_oihw, cp):
    """PyTorch (C, 1, 3, 3) -> (9, Cp) bf16 with zero-padded output channels."""
    C = w_oihw.shape[0]
    wg = jnp.transpose(w_oihw, (2, 3, 1, 0)).reshape(9, C)        # (kh,kw,1,C)->(9,C)
    return jnp.zeros((9, cp), jnp.bfloat16).at[:, :C].set(wg.astype(jnp.bfloat16))


def _conv2_gemm_weights(w_oihw, cp):
    """PyTorch (C, C, 3, 3) -> (9*Cp, Cp) bf16; pad rows/cols are zero so the
    lane-padded (zero) input channels of y1 contribute nothing."""
    C = w_oihw.shape[0]
    wt = jnp.transpose(w_oihw, (2, 3, 1, 0)).astype(jnp.bfloat16)  # (3, 3, C, C)
    wp = jnp.zeros((3, 3, cp, cp), jnp.bfloat16).at[:, :, :C, :C].set(wt)
    return wp.reshape(9 * cp, cp)


def _pad_bias(b, cp):
    C = b.shape[0]
    return jnp.zeros((cp,), jnp.float32).at[:C].set(b.astype(jnp.float32))


def conv2d_subsampling_forward(inputs, input_lengths, params):
    """
    inputs        : (B, T, D) float32
    input_lengths : (B,) int32
    returns       : outputs (B, T', C*D'), output_lengths (B,)
    """
    w1, b1, w2, b2 = params["w1"], params["b1"], params["w2"], params["b2"]
    B, T, D = inputs.shape
    C = w1.shape[0]
    Cp = _round_up(C, LANE)        # lane-pad channels -> dense loads/stores, wide MXU

    # unsqueeze(1): NCHW Cin=1  ->  NHWC Cin=1; cast once to bf16 for the MXU path.
    x = inputs.astype(jnp.bfloat16).reshape(B, T, D, 1)

    # ---- conv1 (1 -> C, k=3, s=2) + ReLU : fused Pallas GEMM ----
    p1, H1, W1 = _im2col(x)                                    # (B, H1, W1, 9) bf16
    y1 = fused_matmul_bias_relu(
        p1.reshape(B * H1 * W1, 9),
        _conv1_gemm_weights(w1, Cp), _pad_bias(b1, Cp),
        out_dtype=jnp.bfloat16)
    y1 = y1.reshape(B, H1, W1, Cp)                             # NHWC, bf16, padded C

    # ---- conv2 (C -> C, k=3, s=2) + ReLU : fused Pallas GEMM ----
    # K = 9*Cp is a multiple of 128, so the patch loads are lane-dense too.
    p2, H2, W2 = _im2col(y1)                                   # (B, H2, W2, 9*Cp)
    y2 = fused_matmul_bias_relu(
        p2.reshape(B * H2 * W2, 9 * Cp),
        _conv2_gemm_weights(w2, Cp), _pad_bias(b2, Cp),
        out_dtype=jnp.float32)
    y2 = y2.reshape(B, H2, W2, Cp)                             # (B, T', D', Cp)

    # permute(0,2,1,3) of the NCHW output == NHWC -> (B, T', Cp, D'); drop the
    # channel padding (no-op when C is already a multiple of 128) and flatten.
    outputs = jnp.transpose(y2, (0, 1, 3, 2))[:, :, :C, :].reshape(B, H2, C * W2)

    output_lengths = (input_lengths >> 2) - 1
    return outputs, output_lengths


# ----------------------------- reference check -------------------------------

def _reference_forward(inputs, input_lengths, params):
    w1, b1, w2, b2 = params["w1"], params["b1"], params["w2"], params["b2"]
    x = inputs[:, None, :, :]                                  # (B, 1, T, D) NCHW
    dn = ("NCHW", "OIHW", "NCHW")
    y = lax.conv_general_dilated(x, w1, (2, 2), "VALID", dimension_numbers=dn)
    y = jnp.maximum(y + b1.reshape(1, -1, 1, 1), 0.0)
    y = lax.conv_general_dilated(y, w2, (2, 2), "VALID", dimension_numbers=dn)
    y = jnp.maximum(y + b2.reshape(1, -1, 1, 1), 0.0)
    B, Cc, Ts, Ds = y.shape
    out = jnp.transpose(y, (0, 2, 1, 3)).reshape(B, Ts, Cc * Ds)
    return out, (input_lengths >> 2) - 1


# --------------------------------- main ---------------------------------------

if __name__ == "__main__":
    key = jax.random.PRNGKey(0)
    k_in, k_w1, k_b1, k_w2, k_b2 = jax.random.split(key, 5)

    B, T, D = 2, 16, 16
    in_channels, out_channels = 1, 8   # forward unsqueezes to 1 input channel

    inputs = jax.random.normal(k_in, (B, T, D), dtype=jnp.float32)
    input_lengths = jnp.array([T, T - 2], dtype=jnp.int32)

    params = {
        "w1": 0.1 * jax.random.normal(k_w1, (out_channels, in_channels, 3, 3), jnp.float32),
        "b1": 0.1 * jax.random.normal(k_b1, (out_channels,), jnp.float32),
        "w2": 0.1 * jax.random.normal(k_w2, (out_channels, out_channels, 3, 3), jnp.float32),
        "b2": 0.1 * jax.random.normal(k_b2, (out_channels,), jnp.float32),
    }

    outputs, output_lengths = conv2d_subsampling_forward(inputs, input_lengths, params)
    jax.block_until_ready(outputs)
    jax.block_until_ready(output_lengths)

    ref_out, ref_len = _reference_forward(inputs, input_lengths, params)
    # bf16 MXU path vs f32 XLA reference -> loose-but-meaningful tolerance.
    np.testing.assert_allclose(np.asarray(outputs), np.asarray(ref_out),
                               rtol=2e-2, atol=2e-2)
    np.testing.assert_array_equal(np.asarray(output_lengths), np.asarray(ref_len))

    print("KERNEL_OK")
</pallas_src>

<mosaic_0001>
module attributes {stable_mosaic.version = 11 : i64} {
  func.func @_matmul_bias_relu_kernel(%arg0: i32, %arg1: memref<98x9xbf16, #tpu.memory_space<vmem>>, %arg2: memref<9x128xbf16, #tpu.memory_space<vmem>>, %arg3: memref<1x128xf32, #tpu.memory_space<vmem>>, %arg4: memref<98x128xbf16, #tpu.memory_space<vmem>>) attributes {dimension_semantics = [#tpu.dimension_semantics<parallel>], iteration_bounds = array<i64: 1>, scalar_prefetch = 0 : i64, scratch_operands = 0 : i64, tpu.core_type = #tpu.core_type<tc>, window_params = [{transform_indices = @transform_0, window_bounds = array<i64: 98, 9>}, {pipeline_mode = #tpu.pipeline_mode<synchronous>, transform_indices = @transform_1, window_bounds = array<i64: 9, 128>}, {pipeline_mode = #tpu.pipeline_mode<synchronous>, transform_indices = @transform_2, window_bounds = array<i64: 1, 128>}, {transform_indices = @transform_3, window_bounds = array<i64: 98, 128>}]} {
    %c0 = arith.constant 0 : index
    %c0_0 = arith.constant 0 : index
    %0 = vector.load %arg1[%c0, %c0_0] : memref<98x9xbf16, #tpu.memory_space<vmem>>, vector<98x9xbf16>
    %c0_1 = arith.constant 0 : index
    %c0_2 = arith.constant 0 : index
    %1 = vector.load %arg2[%c0_1, %c0_2] : memref<9x128xbf16, #tpu.memory_space<vmem>>, vector<9x128xbf16>
    %cst = arith.constant dense<0.000000e+00> : vector<98x128xf32>
    %2 = tpu.matmul %0, %1, %cst {dimension_numbers = #tpu.dot_dimension_numbers<[1], [0], [0], [1], [0, 0, 1, 1], [], []>} : vector<98x9xbf16>, vector<9x128xbf16>, vector<98x128xf32> -> vector<98x128xf32>
    %c0_3 = arith.constant 0 : index
    %c0_4 = arith.constant 0 : index
    %3 = vector.load %arg3[%c0_3, %c0_4] : memref<1x128xf32, #tpu.memory_space<vmem>>, vector<1x128xf32>
    %4 = vector.broadcast %3 : vector<1x128xf32> to vector<98x128xf32>
    %5 = arith.addf %2, %4 : vector<98x128xf32>
    %cst_5 = arith.constant 0.000000e+00 : f32
    %6 = vector.broadcast %cst_5 : f32 to vector<98x128xf32>
    %7 = arith.maximumf %5, %6 : vector<98x128xf32>
    %8 = arith.truncf %7 : vector<98x128xf32> to vector<98x128xbf16>
    %c0_6 = arith.constant 0 : index
    %c0_7 = arith.constant 0 : index
    %9 = vector.load %arg4[%c0_6, %c0_7] : memref<98x128xbf16, #tpu.memory_space<vmem>>, vector<98x128xbf16>
    tpu.vector_store %arg4[%c0_6, %c0_7], %8 {strides = array<i32>} : memref<98x128xbf16, #tpu.memory_space<vmem>>, vector<98x128xbf16>,
    return
  }
  func.func @transform_0(%arg0: i32) -> (i32, i32) {
    %c0_i32 = arith.constant 0 : i32
    %c0_i32_0 = arith.constant 0 : i32
    return %arg0, %c0_i32 : i32, i32
  }
  func.func @transform_1(%arg0: i32) -> (i32, i32) {
    %c0_i32 = arith.constant 0 : i32
    %c0_i32_0 = arith.constant 0 : i32
    %c0_i32_1 = arith.constant 0 : i32
    return %c0_i32, %c0_i32_0 : i32, i32
  }
  func.func @transform_2(%arg0: i32) -> (i32, i32) {
    %c0_i32 = arith.constant 0 : i32
    %c0_i32_0 = arith.constant 0 : i32
    %c0_i32_1 = arith.constant 0 : i32
    return %c0_i32, %c0_i32_0 : i32, i32
  }
  func.func @transform_3(%arg0: i32) -> (i32, i32) {
    %c0_i32 = arith.constant 0 : i32
    %c0_i32_0 = arith.constant 0 : i32
    return %arg0, %c0_i32 : i32, i32
  }
}

</mosaic_0001>

<bundles_post_ra>
// kernel: tpu_custom_call.1
= control target key start
LH: loop header
LB: loop body
LE: loop exit
PB: predicated region body
PF: predicated region fallthrough
CT: control target
= control target key end

     0   :  { %vm98_vm0 = vcmask 1043456   ;;  %v441_v0 = vmov 0.0   ;;  %vm99_vm1 = vcmask 1044480   ;;  %v442_v2 = vmov 65535   ;;  %s526_s0 = inlined_call_operand.vmem [shape: bf16[98,9], index: 0, kind: input, shape index: {}]   ;;  %s527_s1 = inlined_call_operand.vmem [shape: bf16[9,128], index: 1, kind: input, shape index: {}]   ;;  %s528_s2 = inlined_call_operand.vmem [shape: f32[1,128], index: 2, kind: input, shape index: {}]   ;;  %s529_s3 = inlined_call_operand.hbm [shape: bf16[98,128], index: 3, kind: output, shape index: {}]  }
   0x1   :  { %373 = vmatprep.subr.bf16.mxu0 %v441_v0  ;;  %v411_v1 = vld [vmem:[%s527_s1] sm:$0x1f]   ;;  %403 = vmatprep.subr.bf16.mxu1 %v441_v0  ;;  %v100_v3 = vsel %vm98_vm0, 4294967295, %v442_v2  ;;  %vm443_vm2 = vmmov 0   ;;  %vm76_vm3 = vcmask 72704  }
   0x2   :  { %375 = vmatprep.mubr.msk.bf16.mxu0 %vm443_vm2, %v441_v0  ;;  %391 = vmatprep.mubr.msk.bf16.mxu1 %vm443_vm2, %v441_v0  ;;  %v101_v4 = vsel %vm99_vm1, %v100_v3, 0  ;;  %v412_v6 = vld [vmem:[%s526_s0] sm:$0xff]  }
   0x3   :  { %v103_v5 = vand.u32 %v411_v1, %v101_v4  ;;  %v413_v7 = vld [vmem:[%s526_s0 + $0x20] sm:$0xff]  }
   0x5   :  { %374 = vmatpush3.bf16.msra.mxu0 %v103_v5  ;;  %404 = vmatpush3.bf16.msra.mxu1 %v103_v5 }
   0x8   :  { %376 = vmatmul.mubr.msk.bf16.vlgmr.msra.gmra.mxu0 %vm76_vm3, %v412_v6  ;;  %392 = vmatmul.mubr.msk.bf16.vlgmr.msra.gmra.mxu1 %vm76_vm3, %v413_v7 }
   0x9   :  { %8 = vsyncpa [#allocation3], 0  ;;  %379 = vmatprep.mubr.msk.bf16.mxu0 %vm443_vm2, %v441_v0  ;;  %395 = vmatprep.mubr.msk.bf16.mxu1 %vm443_vm2, %v441_v0  ;;  %v414_v8 = vld [vmem:[%s526_s0 + $0x8] sm:$0xff]   ;;  %v416_v10 = vld [vmem:[%s526_s0 + $0x10] sm:$0xff]  }
   0xa   :  { %v415_v9 = vld [vmem:[%s526_s0 + $0x28] sm:$0xff]   ;;  %v417_v11 = vld [vmem:[%s526_s0 + $0x30] ss:$0 sps:$4 sm:$0x11]   ;;  %v418_v12 = vld [vmem:[%s526_s0 + $0x18] sm:$0xff]   ;;  %s444_s0 = smov [#allocation2]  }
   0xb   :  { %v508_v13 = vld [vmem:[%s528_s2] ss:$0 sm:$0xff]  ;;  %s277_s2 = sshll.u32 %s444_s0, 4  ;;  %s278_s2 = int_to_ptr.vmem [resolvable:$true] %s277_s2 }
   0xc   :  { %s419_s29 = scalar_lea.vmem %s278_s2, 832  ;;  %p424_p1 = scmp.lt.s32.totalorder %s278_s2, %s278_s2 }
   0xd   :  { %p420_p0 = scmp.ne.s32.totalorder %s278_s2, %s419_s29  ;;  %p425_p2 = scmp.lt.s32.totalorder %s419_s29, %s419_s29 }
   0xf   :  { %p426_p3 = por %p425_p2, %p424_p1 }
  0x10   :  { %380 = vmatmul.mubr.msk.bf16.gmra.mxu0 %vm76_vm3, %v414_v8  ;;  %396 = vmatmul.mubr.msk.bf16.gmra.mxu1 %vm76_vm3, %v415_v9 }
  0x11   :  { %383 = vmatprep.mubr.msk.bf16.mxu0 %vm443_vm2, %v441_v0  ;;  %399 = vmatprep.mubr.msk.bf16.mxu1 %vm443_vm2, %v441_v0  ;;  %p427_p4 = pnand %p426_p3, %p420_p0 }
  0x18   :  { %384 = vmatmul.mubr.msk.bf16.gmra.mxu0 %vm76_vm3, %v416_v10  ;;  %400 = vmatmul.mubr.msk.bf16.gmra.mxu1 %vm76_vm3, %v417_v11 }
  0x19   :  { %387 = vmatprep.mubr.msk.bf16.mxu0 %vm443_vm2, %v441_v0 }
  0x20   :  { %388 = vmatmul.mubr.msk.bf16.gmra.mxu0 %vm76_vm3, %v418_v12 }
  0xc8   :  { %v139_v14 = vpop.f32.mrf.mxu0  ;;  %v171_v15 = vpop.f32.mrf.mxu1 }
  0xc9   :  { %v172_v16 = vadd.f32 %v508_v13, %v171_v15  ;;  %v140_v19 = vadd.f32 %v508_v13, %v139_v14 }
  0xca   :  { %v377_v17 = vpop.f32.mrf.mxu0  ;;  %v393_v18 = vpop.f32.mrf.mxu1 }
  0xcb   :  { %v201_v23 = vmax.f32 %v172_v16, 0.0  ;;  %v193_v27 = vmax.f32 %v140_v19, 0.0 }
  0xcc   :  { %v142_v20 = vpop.f32.mrf.mxu0  ;;  %v174_v21 = vpop.f32.mrf.mxu1 }
  0xcd   :  { %v143_v22 = vadd.f32 %v508_v13, %v142_v20  ;;  %v175_v24 = vadd.f32 %v508_v13, %v174_v21 }
  0xce   :  { %v378_v25 = vpop.f32.mrf.mxu0  ;;  %v394_v26 = vpop.f32.mrf.mxu1 }
  0xcf   :  { %v194_v28 = vmax.f32 %v143_v22, 0.0  ;;  %v202_v29 = vmax.f32 %v175_v24, 0.0 }
  0xd0   :  { %v147_v30 = vpop.f32.mrf.mxu0  ;;  %v179_v31 = vpop.f32.mrf.mxu1 }
  0xd1   :  { %v333_v32 = vpack.c.bf16 %v194_v28, %v193_v27  ;;  %v353_v33 = vpack.c.bf16 %v202_v29, %v201_v23  ;;  %v180_v34 = vadd.f32 %v508_v13, %v179_v31  ;;  %v148_v37 = vadd.f32 %v508_v13, %v147_v30 }
  0xd2   :  { %v381_v35 = vpop.f32.mrf.mxu0  ;;  %v397_v36 = vpop.f32.mrf.mxu1 }
  0xd3   :  { %334 = vst [vmem:[#allocation2] sm:$0xff] %v333_v32   ;;  %363 = vst [vmem:[#allocation2 + $0x20] sm:$0xff] %v353_v33   ;;  %v203_v41 = vmax.f32 %v180_v34, 0.0  ;;  %v195_v45 = vmax.f32 %v148_v37, 0.0 }
  0xd4   :  { %v150_v38 = vpop.f32.mrf.mxu0  ;;  %v182_v39 = vpop.f32.mrf.mxu1 }
  0xd5   :  { %v151_v40 = vadd.f32 %v508_v13, %v150_v38  ;;  %v183_v42 = vadd.f32 %v508_v13, %v182_v39 }
  0xd6   :  { %v382_v43 = vpop.f32.mrf.mxu0  ;;  %v398_v44 = vpop.f32.mrf.mxu1 }
  0xd7   :  { %v196_v46 = vmax.f32 %v151_v40, 0.0  ;;  %v204_v47 = vmax.f32 %v183_v42, 0.0 }
  0xd8   :  { %v155_v48 = vpop.f32.mrf.mxu0  ;;  %v187_v49 = vpop.f32.mrf.mxu1 }
  0xd9   :  { %v338_v50 = vpack.c.bf16 %v196_v46, %v195_v45  ;;  %v358_v51 = vpack.c.bf16 %v204_v47, %v203_v41  ;;  %v188_v52 = vadd.f32 %v508_v13, %v187_v49  ;;  %v156_v55 = vadd.f32 %v508_v13, %v155_v48 }
  0xda   :  { %v385_v53 = vpop.f32.mrf.mxu0  ;;  %v401_v54 = vpop.f32.mrf.mxu1 }
  0xdb   :  { %360 = vst [vmem:[#allocation2 + $0x8] sm:$0xff] %v338_v50   ;;  %364 = vst [vmem:[#allocation2 + $0x28] sm:$0xff] %v358_v51   ;;  %v205_v56 = vmax.f32 %v188_v52, 0.0  ;;  %v197_v63 = vmax.f32 %v156_v55, 0.0 }
  0xdc   :  { %v158_v57 = vpop.f32.mrf.mxu0  ;;  %v190_v58 = vpop.f32.mrf.mxu1 }
  0xdd   :  { %v159_v59 = vadd.f32 %v508_v13, %v158_v57  ;;  %v329_v60 = vpack.c.bf16 %v205_v56, %v205_v56 }
  0xde   :  { %v386_v61 = vpop.f32.mrf.mxu0  ;;  %v402_v62 = vpop.f32.mrf.mxu1 }
  0xdf   :  { %v198_v0 = vmax.f32 %v159_v59, 0.0  ;;  %271 = vst [vmem:[#allocation2 + $0x30] sm:$0x1] %v329_v60 }
  0xe0   :  { %v163_v1 = vpop.f32.mrf.mxu0 }
  0xe1   :  { %v343_v2 = vpack.c.bf16 %v198_v0, %v197_v63  ;;  %v164_v4 = vadd.f32 %v508_v13, %v163_v1 }
  0xe2   :  { %v389_v3 = vpop.f32.mrf.mxu0 }
  0xe3   :  { %361 = vst [vmem:[#allocation2 + $0x10] sm:$0xff] %v343_v2   ;;  %v199_v8 = vmax.f32 %v164_v4, 0.0 }
  0xe4   :  { %v166_v5 = vpop.f32.mrf.mxu0 }
  0xe5   :  { %v167_v6 = vadd.f32 %v508_v13, %v166_v5 }
  0xe6   :  { %v390_v7 = vpop.f32.mrf.mxu0 }
  0xe7   :  { %v200_v9 = vmax.f32 %v167_v6, 0.0 }
  0xe9   :  { %v348_v10 = vpack.c.bf16 %v200_v9, %v199_v8 }
  0xeb   :  { %362 = vst [vmem:[#allocation2 + $0x18] sm:$0xff] %v348_v10  }
  0xec   :  { %430 = shalt.err (!%p427_p4)
}
  0xed   :  { %s445_s30 = smov 64   ;;  %s446_s4 = smov 4  }
  0xee   :  { %283 = dma.vmem_to_hbm [thread:$0]  %s278_s2, 832, %s529_s3, [#allocation3], %s445_s30, %s445_s30, %s446_s4  }
  0xef   :  { %439 = dma.done.wait [#allocation3], 832  }
  0xf0   :  { %440 = vsyncadd [#allocation3], 4294966464 }
  0xf1   :  { %287 = vsyncpa [#allocation3], 1 }

</bundles_post_ra>
